<compile_context>
chip_gen: v7x
topology: tpu7x:2x2x1
jax: 0.10.0
libtpu: 0.0.40
codegen_flags: <defaults>
</compile_context>

<pallas_src>
import jax
import jax.numpy as jnp
from jax.experimental import pallas as pl
from jax.experimental.pallas import tpu as pltpu


def joint_kernel(th_ref, ph_ref, w2_ref, b2_ref, out_ref, h_ref):
    """Produces one (tT, tU, tV) logits tile.

    th_ref : (1, tT, H)   precomputed trans @ W1a                  (f32)
    ph_ref : (1, tU, H)   precomputed pred  @ W1b + b1             (f32)
    w2_ref : (H, tV)      lane-dense projection-weight slice
    b2_ref : (1, tV)
    out_ref: (1, tT, tU, tV)
    h_ref  : (tT*tU, H)   cached tanh hidden, MXU-input dtype (scratch)
    """
    v_idx = pl.program_id(3)

    # The tanh hidden state depends only on (b, i, u): compute it once at the
    # start of each V sweep (v is innermost) and cache it in VMEM, already
    # cast to the MXU input dtype.  tanh/bias math is f32 (VPU/EUP).
    @pl.when(v_idx == 0)
    def _():
        th = th_ref[0].astype(jnp.float32)                 # (tT, H)
        ph = ph_ref[0].astype(jnp.float32)                 # (tU, H)
        h = jnp.tanh(th[:, None, :] + ph[None, :, :])      # (tT, tU, H) f32
        h_ref[...] = h.reshape(h_ref.shape).astype(h_ref.dtype)

    # project_layer on an (H, tV) slice of W2.  h is in w2's dtype so the MXU
    # runs at native rate (bf16 path); accumulation stays f32.  tV is a
    # multiple of 128 => unmasked full-lane stores.
    out = jnp.dot(h_ref[...], w2_ref[...],
                  preferred_element_type=jnp.float32) + b2_ref[...]
    out_ref[...] = out.reshape(out_ref.shape).astype(out_ref.dtype)


# ----------------------------- tiling helpers -------------------------------

def _round_up(x, m):
    return ((x + m - 1) // m) * m


def _sublane(dtype):
    """Required sublane multiple for a block's second-to-last dim."""
    return {4: 8, 2: 16, 1: 32}[jnp.dtype(dtype).itemsize]


def _pick_lane_tile(vp, cap):
    """Largest multiple of 128 that divides vp and is <= cap."""
    best = 128
    for d in range(128, min(vp, cap) + 1, 128):
        if vp % d == 0:
            best = d
    return best


def _select_tiles(T, U, H, Vp, *, in_item, cd_item, out_item, w2_item,
                  budget, sT, sU, tT_cap, tU_cap, tV_cap):
    """Pick (tT, tU, tV) so the per-step VMEM footprint fits the budget."""
    tV = _pick_lane_tile(Vp, tV_cap)
    nV = Vp // tV
    w2_bufs = 1 if nV == 1 else 2   # single-buffer grid-invariant W2/b2

    tT = min(_round_up(T, sT), max(sT, (tT_cap // sT) * sT))
    tU = min(_round_up(U, sU), max(sU, (tU_cap // sU) * sU))

    def footprint(tt, tu):
        return (2 * tt * tu * tV * out_item        # double-buffered out block
                + tt * tu * tV * 4                 # f32 pre-cast projection temp
                + tt * tu * H * cd_item            # cached tanh hidden scratch
                + tt * tu * H * 4                  # f32 broadcast/tanh temp
                + 2 * tt * H * in_item             # double-buffered TH tile
                + 2 * tu * H * in_item             # double-buffered PH tile
                + w2_bufs * (H + 1) * tV * w2_item)  # W2 slice + b2

    def halve(t, s):
        return max(s, ((t // 2) // s) * s)

    while footprint(tT, tU) > budget and (tT > sT or tU > sU):
        if tT >= 2 * tU and tT > sT:
            tT = halve(tT, sT)
        elif tU > sU:
            tU = halve(tU, sU)
        else:
            tT = halve(tT, sT)
    return tT, tU, tV, footprint(tT, tU)


def _spec(shape, index_map, buffers=2):
    """BlockSpec with optional single-buffering (graceful fallback)."""
    if buffers == 2:
        return pl.BlockSpec(shape, index_map)
    try:
        return pl.BlockSpec(shape, index_map, pipeline_mode=pl.Buffered(buffers))
    except TypeError:
        return pl.BlockSpec(shape, index_map)


# --------------------------------- wrapper -----------------------------------

def joint_net(trans, pred, w1a, w1b, b1, w2, b2, *,
              out_dtype=None, tT_cap=64, tU_cap=32, tV_cap=2048):
    B, T, D1 = trans.shape
    _, U, D2 = pred.shape
    H = w1a.shape[1]
    V = w2.shape[1]
    out_dtype = jnp.dtype(out_dtype or trans.dtype)
    compute_dtype = jnp.dtype(w2.dtype)       # MXU input dtype for projection

    # First layer hoisted to XLA (tiny fraction of FLOPs); bias folded into PH.
    th = jnp.dot(trans, w1a, preferred_element_type=jnp.float32)   # (B,T,H) f32
    ph = (jnp.dot(pred, w1b, preferred_element_type=jnp.float32)
          + b1.astype(jnp.float32))                                # (B,U,H) f32

    in_item = 4                                  # TH/PH kept f32 for tanh math
    cd_item = compute_dtype.itemsize
    out_item = out_dtype.itemsize
    w2_item = jnp.dtype(w2.dtype).itemsize

    # Generation-aware VMEM budget (v5e/v6e: 128 MiB, v7x: 64 MiB per core).
    try:
        vmem_cap = int(pltpu.get_tpu_info().vmem_capacity_bytes)
    except Exception:
        vmem_cap = 64 * 2**20                    # conservative fallback (v7x)
    budget = int(vmem_cap * 0.70)

    # Lane-dense output: pad V up to a multiple of 128.
    Vp = _round_up(V, 128)

    sT = _sublane(jnp.float32)                               # TH block sublane
    sU = max(_sublane(jnp.float32), _sublane(out_dtype))     # PH + out sublane
    tT, tU, tV, vmem_est = _select_tiles(
        T, U, H, Vp, in_item=in_item, cd_item=cd_item, out_item=out_item,
        w2_item=w2_item, budget=budget, sT=sT, sU=sU,
        tT_cap=tT_cap, tU_cap=tU_cap, tV_cap=tV_cap)

    # Pad T/U to tile multiples (cdiv grid); padded rows are sliced off below.
    Tp, Up = _round_up(T, tT), _round_up(U, tU)
    if Tp != T:
        th = jnp.pad(th, ((0, 0), (0, Tp - T), (0, 0)))
    if Up != U:
        ph = jnp.pad(ph, ((0, 0), (0, Up - U), (0, 0)))
    if Vp != V:
        w2p = jnp.pad(w2, ((0, 0), (0, Vp - V)))
        b2p = jnp.pad(b2, ((0, 0), (0, Vp - V)))
    else:
        w2p, b2p = w2, b2

    nT, nU, nV = Tp // tT, Up // tU, Vp // tV
    grid = (B, nT, nU, nV)
    w2_bufs = 1 if nV == 1 else 2

    # Advisory cost estimate (projection dominates).
    flops = 2 * B * Tp * Up * H * Vp
    transcendentals = B * Tp * Up * H
    bytes_accessed = (
        B * Tp * Up * Vp * out_item                          # logits writeback
        + B * Tp * H * in_item                               # TH (once per (b,i))
        + B * nT * Up * H * in_item                          # PH re-streamed per T-tile
        + (H + 1) * Vp * w2_item * (1 if nV == 1 else B * nT * nU))  # W2/b2
    cost = pl.CostEstimate(flops=int(flops),
                           transcendentals=int(transcendentals),
                           bytes_accessed=int(bytes_accessed))

    # VMEM limit: generous vs the estimate but never above physical capacity.
    vmem_limit = int(max(32 * 2**20,
                         min(2 * vmem_est + (4 << 20), vmem_cap - (8 << 20))))

    out_padded = pl.pallas_call(
        joint_kernel,
        out_shape=jax.ShapeDtypeStruct((B, Tp, Up, Vp), out_dtype),
        grid_spec=pltpu.PrefetchScalarGridSpec(
            num_scalar_prefetch=0,
            grid=grid,
            in_specs=[
                _spec((1, tT, H), lambda b, i, u, v: (b, i, 0)),
                _spec((1, tU, H), lambda b, i, u, v: (b, u, 0)),
                _spec((H, tV), lambda b, i, u, v: (0, v), buffers=w2_bufs),
                _spec((1, tV), lambda b, i, u, v: (0, v), buffers=w2_bufs),
            ],
            out_specs=pl.BlockSpec((1, tT, tU, tV),
                                   lambda b, i, u, v: (b, i, u, v)),
            scratch_shapes=[pltpu.VMEM((tT * tU, H), compute_dtype)],
        ),
        compiler_params=pltpu.CompilerParams(
            dimension_semantics=("parallel", "parallel", "parallel",
                                 "arbitrary"),
            vmem_limit_bytes=vmem_limit),
        cost_estimate=cost,
    )(th, ph, w2p, b2p)

    if (Tp, Up, Vp) != (T, U, V):
        out_padded = out_padded[:, :T, :U, :V]
    return out_padded


def joint_net_ref(trans, pred, w1a, w1b, b1, w2, b2):
    """Pure-JAX reference mirroring the PyTorch forward (repeat + concat)."""
    B, T, D1 = trans.shape
    _, U, D2 = pred.shape
    t_exp = jnp.broadcast_to(trans[:, :, None, :], (B, T, U, D1))
    p_exp = jnp.broadcast_to(pred[:, None, :, :], (B, T, U, D2))
    cat = jnp.concatenate([t_exp, p_exp], axis=-1)            # (B,T,U,D1+D2)
    w1 = jnp.concatenate([w1a, w1b], axis=0)                  # (D1+D2, H)
    h = jnp.tanh(cat @ w1 + b1[0])
    return h @ w2 + b2[0]


if __name__ == "__main__":
    # Small shapes consistent with the module (input_dim = D1 + D2).
    B, T, U = 2, 8, 8
    D1, D2 = 16, 16          # transcription / prediction output dims
    H = 32                   # hidden_dim
    V = 110                  # vocab_size (from docstring)

    key = jax.random.PRNGKey(0)
    k1, k2, k3, k4, k5, k6, k7 = jax.random.split(key, 7)

    trans = jax.random.normal(k1, (B, T, D1), dtype=jnp.float32)
    pred = jax.random.normal(k2, (B, U, D2), dtype=jnp.float32)

    # Deterministic parameter init (synthetic; no checkpoint loading).
    scale1 = 1.0 / jnp.sqrt(D1 + D2)
    scale2 = 1.0 / jnp.sqrt(H)
    w1a = jax.random.uniform(k3, (D1, H), jnp.float32, -scale1, scale1)
    w1b = jax.random.uniform(k4, (D2, H), jnp.float32, -scale1, scale1)
    b1 = jax.random.uniform(k5, (1, H), jnp.float32, -scale1, scale1)
    w2 = jax.random.uniform(k6, (H, V), jnp.float32, -scale2, scale2)
    b2 = jax.random.uniform(k7, (1, V), jnp.float32, -scale2, scale2)

    ref = joint_net_ref(trans, pred, w1a, w1b, b1, w2, b2)

    # Divisible shapes.
    out = jax.block_until_ready(joint_net(trans, pred, w1a, w1b, b1, w2, b2))
    assert out.shape == (B, T, U, V)
    assert jnp.allclose(out, ref, atol=1e-5, rtol=1e-5)

    # Non-divisible T/U exercise the cdiv/padding path.
    T2, U2 = 7, 5
    out2 = jax.block_until_ready(
        joint_net(trans[:, :T2], pred[:, :U2], w1a, w1b, b1, w2, b2))
    assert out2.shape == (B, T2, U2, V)
    assert jnp.allclose(out2, ref[:, :T2, :U2], atol=1e-5, rtol=1e-5)

    print("KERNEL_OK")
</pallas_src>

<mosaic_0001>
module attributes {stable_mosaic.version = 11 : i64} {
  func.func @joint_kernel(%arg0: i32, %arg1: i32, %arg2: i32, %arg3: i32, %arg4: memref<1x8x32xf32, #tpu.memory_space<vmem>>, %arg5: memref<1x8x32xf32, #tpu.memory_space<vmem>>, %arg6: memref<32x128xf32, #tpu.memory_space<vmem>>, %arg7: memref<1x128xf32, #tpu.memory_space<vmem>>, %arg8: memref<1x8x8x128xf32, #tpu.memory_space<vmem>>, %arg9: memref<64x32xf32, #tpu.memory_space<vmem>>) attributes {dimension_semantics = [#tpu.dimension_semantics<parallel>, #tpu.dimension_semantics<parallel>, #tpu.dimension_semantics<parallel>, #tpu.dimension_semantics<arbitrary>], iteration_bounds = array<i64: 2, 1, 1, 1>, scalar_prefetch = 0 : i64, scratch_operands = 1 : i64, tpu.core_type = #tpu.core_type<tc>, window_params = [{transform_indices = @transform_0, window_bounds = array<i64: 1, 8, 32>}, {transform_indices = @transform_1, window_bounds = array<i64: 1, 8, 32>}, {pipeline_mode = #tpu.pipeline_mode<synchronous>, transform_indices = @transform_2, window_bounds = array<i64: 32, 128>}, {pipeline_mode = #tpu.pipeline_mode<synchronous>, transform_indices = @transform_3, window_bounds = array<i64: 1, 128>}, {transform_indices = @transform_4, window_bounds = array<i64: 1, 8, 8, 128>}]} {
    %c0_i32 = arith.constant 0 : i32
    %0 = arith.cmpi eq, %arg3, %c0_i32 : i32
    %1 = arith.extui %0 : i1 to i32
    %c0_i32_0 = arith.constant 0 : i32
    %2 = arith.cmpi ne, %1, %c0_i32_0 : i32
    scf.if %2 {
      %c0_10 = arith.constant 0 : index
      %c0_11 = arith.constant 0 : index
      %c0_12 = arith.constant 0 : index
      %11 = vector.load %arg4[%c0_10, %c0_11, %c0_12] : memref<1x8x32xf32, #tpu.memory_space<vmem>>, vector<1x8x32xf32>
      %12 = vector.shape_cast %11 : vector<1x8x32xf32> to vector<8x32xf32>
      %c0_13 = arith.constant 0 : index
      %c0_14 = arith.constant 0 : index
      %c0_15 = arith.constant 0 : index
      %13 = vector.load %arg5[%c0_13, %c0_14, %c0_15] : memref<1x8x32xf32, #tpu.memory_space<vmem>>, vector<1x8x32xf32>
      %14 = vector.shape_cast %13 : vector<1x8x32xf32> to vector<8x32xf32>
      %15 = vector.shape_cast %12 : vector<8x32xf32> to vector<8x1x32xf32>
      %16 = vector.shape_cast %14 : vector<8x32xf32> to vector<1x8x32xf32>
      %17 = vector.broadcast %15 : vector<8x1x32xf32> to vector<8x8x32xf32>
      %18 = vector.broadcast %16 : vector<1x8x32xf32> to vector<8x8x32xf32>
      %19 = arith.addf %17, %18 : vector<8x8x32xf32>
      %20 = math.tanh %19 : vector<8x8x32xf32>
      %21 = vector.shape_cast %20 : vector<8x8x32xf32> to vector<64x32xf32>
      %c0_16 = arith.constant 0 : index
      %c0_17 = arith.constant 0 : index
      %22 = vector.load %arg9[%c0_16, %c0_17] : memref<64x32xf32, #tpu.memory_space<vmem>>, vector<64x32xf32>
      tpu.vector_store %arg9[%c0_16, %c0_17], %21 {strides = array<i32>} : memref<64x32xf32, #tpu.memory_space<vmem>>, vector<64x32xf32>,
    } else {
    }
    %c0 = arith.constant 0 : index
    %c0_1 = arith.constant 0 : index
    %3 = vector.load %arg9[%c0, %c0_1] : memref<64x32xf32, #tpu.memory_space<vmem>>, vector<64x32xf32>
    %c0_2 = arith.constant 0 : index
    %c0_3 = arith.constant 0 : index
    %4 = vector.load %arg6[%c0_2, %c0_3] : memref<32x128xf32, #tpu.memory_space<vmem>>, vector<32x128xf32>
    %cst = arith.constant dense<0.000000e+00> : vector<64x128xf32>
    %5 = tpu.matmul %3, %4, %cst {dimension_numbers = #tpu.dot_dimension_numbers<[1], [0], [0], [1], [0, 0, 1, 1], [], []>} : vector<64x32xf32>, vector<32x128xf32>, vector<64x128xf32> -> vector<64x128xf32>
    %c0_4 = arith.constant 0 : index
    %c0_5 = arith.constant 0 : index
    %6 = vector.load %arg7[%c0_4, %c0_5] : memref<1x128xf32, #tpu.memory_space<vmem>>, vector<1x128xf32>
    %7 = vector.broadcast %6 : vector<1x128xf32> to vector<64x128xf32>
    %8 = arith.addf %5, %7 : vector<64x128xf32>
    %9 = vector.shape_cast %8 : vector<64x128xf32> to vector<1x8x8x128xf32>
    %c0_6 = arith.constant 0 : index
    %c0_7 = arith.constant 0 : index
    %c0_8 = arith.constant 0 : index
    %c0_9 = arith.constant 0 : index
    %10 = vector.load %arg8[%c0_6, %c0_7, %c0_8, %c0_9] : memref<1x8x8x128xf32, #tpu.memory_space<vmem>>, vector<1x8x8x128xf32>
    tpu.vector_store %arg8[%c0_6, %c0_7, %c0_8, %c0_9], %9 {strides = array<i32>} : memref<1x8x8x128xf32, #tpu.memory_space<vmem>>, vector<1x8x8x128xf32>,
    return
  }
  func.func @transform_0(%arg0: i32, %arg1: i32, %arg2: i32, %arg3: i32) -> (i32, i32, i32) {
    %c0_i32 = arith.constant 0 : i32
    %c0_i32_0 = arith.constant 0 : i32
    return %arg0, %arg1, %c0_i32 : i32, i32, i32
  }
  func.func @transform_1(%arg0: i32, %arg1: i32, %arg2: i32, %arg3: i32) -> (i32, i32, i32) {
    %c0_i32 = arith.constant 0 : i32
    %c0_i32_0 = arith.constant 0 : i32
    return %arg0, %arg2, %c0_i32 : i32, i32, i32
  }
  func.func @transform_2(%arg0: i32, %arg1: i32, %arg2: i32, %arg3: i32) -> (i32, i32) {
    %c0_i32 = arith.constant 0 : i32
    %c0_i32_0 = arith.constant 0 : i32
    return %c0_i32, %arg3 : i32, i32
  }
  func.func @transform_3(%arg0: i32, %arg1: i32, %arg2: i32, %arg3: i32) -> (i32, i32) {
    %c0_i32 = arith.constant 0 : i32
    %c0_i32_0 = arith.constant 0 : i32
    return %c0_i32, %arg3 : i32, i32
  }
  func.func @transform_4(%arg0: i32, %arg1: i32, %arg2: i32, %arg3: i32) -> (i32, i32, i32, i32) {
    %c0_i32 = arith.constant 0 : i32
    return %arg0, %arg1, %arg2, %arg3 : i32, i32, i32, i32
  }
}

</mosaic_0001>

<bundles_post_ra>
// kernel: tpu_custom_call.1
= control target key start
LH: loop header
LB: loop body
LE: loop exit
PB: predicated region body
PF: predicated region fallthrough
CT: control target
= control target key end

     0   :  { %s1415_s0 = inlined_call_operand.hbm [shape: f32[2,8,32], index: 0, kind: input, shape index: {}]   ;;  %s1416_s1 = inlined_call_operand.hbm [shape: f32[2,8,32], index: 1, kind: input, shape index: {}]   ;;  %s1417_s2 = inlined_call_operand.hbm [shape: f32[32,128], index: 2, kind: input, shape index: {}]   ;;  %s1418_s3 = inlined_call_operand.vmem [shape: f32[1,128], index: 3, kind: input, shape index: {}]   ;;  %s1419_s4 = inlined_call_operand.hbm [shape: f32[2,8,8,128], index: 4, kind: output, shape index: {}]  }
   0x1   :  { %1426 = sst [smem:[#allocation16_spill]] %s1417_s2 }
   0x2   :  { %9 = vsyncpa [#allocation4], 0 }
   0x3   :  { %11 = vsyncpa [#allocation4 + $0x1], 0 }
   0x4   :  { %12 = vsyncpa [#allocation7], 0 }
   0x5   :  { %14 = vsyncpa [#allocation7 + $0x1], 0 }
   0x6   :  { %15 = vsyncpa [#allocation5], 0 }
   0x7   :  { %17 = vsyncpa [#allocation5 + $0x1], 0  ;;  %s1147_s15 = smov 0   ;;  %s1149_s16 = smov 0  }
   0x8   :  { %s1151_s17 = smov 0   ;;  %s1153_s18 = smov 0  }
   0x9   :  { %s1155_s19 = smov 0   ;;  %s1157_s20 = smov 0  }
   0xa LB: > { %1427 = sst [smem:[#allocation14_spill]] %s1107_s19  ;;  %s1178_s21 = sadd.s32 4294967295, %s1111_s20   ;;  %s1111_s20 = sphi %s1157_s20, %s23_s20   ;;  %s1107_s19 = sphi %s1155_s19, %s1446_s19   ;;  %s1103_s18 = sphi %s1153_s18, %s1445_s18   ;;  %s1099_s17 = sphi %s1151_s17, %s1449_s17   ;;  %s1095_s16 = sphi %s1149_s16, %s1448_s16   ;;  %s1091_s15 = sphi %s1147_s15, %s1447_s15  }
   0xb   : > { %s761_s22 = sadd.s32 4294967294, %s1111_s20   ;;  %p71_p0 = scmp.ne.s32.totalorder %s1095_s16, %s1091_s15 }
   0xc   : > { %p1420_p1 = scmp.eq.s32.totalorder %s1178_s21, 0  ;;  %p187_p3 = scmp.eq.s32.totalorder %s761_s22, 1 }
   0xd   : > { %p762_p5 = scmp.ge.s32.totalorder %s1111_s20, 1  ;;  %p194_p7 = scmp.lt.s32.totalorder %s1111_s20, 3 }
   0xe   : > { %p1187_p4 = por %p1420_p1, %p71_p0  ;;  %p1192_p6 = por %p187_p3, %p71_p0 }
   0xf   : > { %p1197_p8 = pnand %p762_p5, %p194_p7  ;;  %s1113_s26 = smov [#allocation8]  }
  0x10   : > { %s1428_s23 = scalar_select %p1187_p4, 1, 0 }
  0x11   : > { %s1429_s24 = scalar_select %p1192_p6, 1, 0 }
  0x12   : > { %s1430_s25 = scalar_select %p1197_p8, 1, 0 }
  0x13   : > { %s208_s27 = sshll.u32 %s1113_s26, 4  ;;  %p844_p9 = pneg %p1197_p8  ;;  %s209_s27 = int_to_ptr.vmem [resolvable:$true] %s208_s27 }
  0x14   : > { %s49_s29 = sadd.s32 1, %s1107_s19  ;;  %s1432_s2 = sld [smem:[#allocation16_spill]] }
  0x15   : > { %p1206_p11 = pnand %p844_p9, %p1420_p1 }
  0x17   : > { %p935_p13 = pneg %p1206_p11 }
  0x1a   : > { %s933_s6 = scalar_lea.hbm %s1432_s2, 512 }
  0x1b   : > { %p934_p12 = scmp.ne.s32.totalorder %s1432_s2, %s933_s6  ;;  %p940_p5 = scmp.lt.u32.totalorder %s933_s6, %s1432_s2 }
  0x1d   : > { %p936_p0 = pnand %p935_p13, %p934_p12 }
  0x1f   : > { %p937_p3 = pneg %p936_p0 }
  0x21   : > { %p942_p7 = pnand %p940_p5, %p937_p3 }
  0x23   : > { %945 = shalt.err (!%p942_p7)
}
  0x24   : > { %s946_s11 = scalar_lea.vmem %s209_s27, 512  ;;  %p954_p2 = scmp.lt.s32.totalorder %s209_s27, %s209_s27 }
  0x25   : > { %p947_p9 = scmp.ne.s32.totalorder %s209_s27, %s946_s11  ;;  %p955_p6 = scmp.lt.s32.totalorder %s946_s11, %s946_s11 }
  0x27   : > { %p949_p10 = pnand %p947_p9, %p935_p13  ;;  %p956_p4 = por %p955_p6, %p954_p2 }
  0x29   : > { %p950_p1 = pneg %p949_p10 }
  0x2b   : > { %p957_p8 = pnand %p956_p4, %p950_p1 }
  0x2d   : > { %960 = shalt.err (!%p957_p8)
}
  0x2e   : > { %s1114_s12 = smov 128   ;;  %s1115_s13 = smov 8  }
  0x2f   : > { %847 = dma.hbm_to_vmem [thread:$0]  (!%p1206_p11), %s1432_s2, 512, %s209_s27, [#allocation7], %s1114_s12, %s1114_s12, %s1115_s13  }
  0x30   : > { %p51_p1 = scmp.ge.s32.totalorder %s49_s29, 2  ;;  %s58_s26 = sadd.s32 1, %s1099_s17 }
  0x31   : > { %p65_p2 = scmp.ne.s32.totalorder %s1099_s17, %s1095_s16  ;;  %p66_p4 = scmp.eq.s32.totalorder %s1111_s20, 0 }
  0x32   : > { %s1451_s29 = smov (%p51_p1, %s49_s29), 0  ;;  %p1435_p8 = scmp.eq.s32.totalorder %s1178_s21, 1 }
  0x33   : > { %1433 = sst [smem:[#allocation15_spill]] %s1451_s29  ;;  %p1233_p6 = por %p66_p4, %p65_p2 }
  0x34   : > { %p1239_p10 = por %p1435_p8, %p65_p2  ;;  %s53_s5 = ssub.s32 %s1107_s19, %s1451_s29 }
  0x35   : > { %p860_p11 = scmp.lt.s32.totalorder %s1111_s20, 2  ;;  %p56_p12 = scmp.eq.s32.totalorder %s53_s5, 0 }
  0x36   : > { %s1436_s28 = scalar_select %p1239_p10, 1, 0 }
  0x37   : > { %s228_s27 = sand.u32 1, %s1099_s17   ;;  %s767_s8 = sshll.u32 %s1107_s19, 7 }
  0x38   : > { %s1247_s6 = sshll.u32 %s228_s27, 3  ;;  %s1256_s11 = scalar_lea.hbm %s1415_s0, %s767_s8 }
  0x39   : > { %s1250_s7 = scalar_select %p56_p12, %s1099_s17, %s58_s26  }
  0x3a   : > { %s232_s12 = scalar_lea.vmem [#allocation3], %s1247_s6  ;;  %p1263_p13 = pnand %p860_p11, %p1233_p6 }
  0x3b   : > { %s240_s13 = sshll.u32 %s232_s12, 4  ;;  %s1270_s5 = scalar_lea.hbm %s1416_s1, %s767_s8  ;;  %s1259_s13 = int_to_ptr.vmem [resolvable:$true] %s240_s13 }
  0x3c   : > { %s247_s9 = sand.u32 1, %s1111_s20   ;;  %s229_s10 = scalar_lea.sflag [#allocation4], %s228_s27 }
  0x3d   : > { %s961_s2 = scalar_lea.hbm %s1256_s11, 128  ;;  %p963_p3 = pneg %p1263_p13 }
  0x3e   : > { %p962_p0 = scmp.ne.s32.totalorder %s1256_s11, %s961_s2  ;;  %s966_s29 = scalar_lea.hbm %s1415_s0, 256 }
  0x3f   : > { %p967_p9 = scmp.lt.u32.totalorder %s1256_s11, %s1415_s0  ;;  %p968_p1 = scmp.lt.u32.totalorder %s966_s29, %s961_s2 }
  0x40   : > { %p964_p5 = pnand %p963_p3, %p962_p0  ;;  %p970_p4 = scmp.lt.u32.totalorder %s961_s2, %s1256_s11 }
  0x41   : > { %p969_p2 = por %p968_p1, %p967_p9 }
  0x42   : > { %p965_p7 = pneg %p964_p5 }
  0x43   : > { %p971_p6 = por %p970_p4, %p969_p2 }
  0x45   : > { %p972_p8 = pnand %p971_p6, %p965_p7 }
  0x47   : > { %975 = shalt.err (!%p972_p8)
}
  0x48   : > { %s976_s27 = scalar_lea.vmem %s1259_s13, 128  ;;  %s1116_s8 = smov [#allocation3]  }
  0x49   : > { %p977_p11 = scmp.ne.s32.totalorder %s1259_s13, %s976_s27  ;;  %s981_s26 = sshll.u32 %s1116_s8, 4  ;;  %s982_s26 = int_to_ptr.vmem [resolvable:$false] %s981_s26 }
  0x4a   : > { %s983_s19 = scalar_lea.vmem %s982_s26, 256  ;;  %p984_p5 = scmp.lt.s32.totalorder %s1259_s13, %s982_s26 }
  0x4b   : > { %p979_p12 = pnand %p977_p11, %p963_p3  ;;  %p985_p9 = scmp.lt.s32.totalorder %s983_s19, %s976_s27 }
  0x4d   : > { %p980_p0 = pneg %p979_p12  ;;  %p986_p1 = por %p985_p9, %p984_p5 }
  0x4f   : > { %p987_p2 = pnand %p986_p1, %p980_p0 }
  0x51   : > { %990 = shalt.err (!%p987_p2)
}
  0x52   : > { %851 = dma.hbm_to_vmem [thread:$0]  (!%p1263_p13), %s1256_s11, 128, %s1259_s13, %s229_s10  }
  0x53   : > { %s251_s2 = scalar_lea.vmem [#allocation6], %s1247_s6  ;;  %s248_s30 = scalar_lea.sflag [#allocation7], %s247_s9 }
  0x54   : > { %s259_s29 = sshll.u32 %s251_s2, 4  ;;  %s991_s12 = scalar_lea.hbm %s1270_s5, 128  ;;  %s260_s29 = int_to_ptr.vmem [resolvable:$true] %s259_s29 }
  0x55   : > { %p992_p7 = scmp.ne.s32.totalorder %s1270_s5, %s991_s12  ;;  %s996_s8 = scalar_lea.hbm %s1416_s1, 256 }
  0x56   : > { %p997_p8 = scmp.lt.u32.totalorder %s1270_s5, %s1416_s1  ;;  %p998_p11 = scmp.lt.u32.totalorder %s996_s8, %s991_s12 }
  0x57   : > { %p994_p4 = pnand %p992_p7, %p963_p3  ;;  %p1000_p0 = scmp.lt.u32.totalorder %s991_s12, %s1270_s5 }
  0x58   : > { %p999_p12 = por %p998_p11, %p997_p8 }
  0x59   : > { %p995_p6 = pneg %p994_p4 }
  0x5a   : > { %p1001_p5 = por %p1000_p0, %p999_p12 }
  0x5c   : > { %p1002_p9 = pnand %p1001_p5, %p995_p6 }
  0x5e   : > { %1005 = shalt.err (!%p1002_p9)
}
  0x5f   : > { %s1006_s6 = scalar_lea.vmem %s260_s29, 128  ;;  %s1117_s11 = smov [#allocation6]  }
  0x60   : > { %p1007_p1 = scmp.ne.s32.totalorder %s260_s29, %s1006_s6  ;;  %s1011_s13 = sshll.u32 %s1117_s11, 4  ;;  %s1012_s13 = int_to_ptr.vmem [resolvable:$false] %s1011_s13 }
  0x61   : > { %s1013_s9 = scalar_lea.vmem %s1012_s13, 256  ;;  %p1014_p4 = scmp.lt.s32.totalorder %s260_s29, %s1012_s13 }
  0x62   : > { %p1009_p2 = pnand %p1007_p1, %p963_p3  ;;  %p1015_p10 = scmp.lt.s32.totalorder %s1013_s9, %s1006_s6 }
  0x64   : > { %p1010_p7 = pneg %p1009_p2  ;;  %p1016_p8 = por %p1015_p10, %p1014_p4 }
  0x66   : > { %p1017_p11 = pnand %p1016_p8, %p1010_p7 }
  0x68   : > { %1020 = shalt.err (!%p1017_p11)
}
  0x69   : > { %854 = dma.hbm_to_vmem [thread:$0]  (!%p1263_p13), %s1270_s5, 128, %s260_s29, %s248_s30  }
  0x6a   : > { %p1438_p6 = scmp.ne.s32.totalorder %s1430_s25, 0 }
  0x6b   : > { %s1323_s10 = sand.u32 (!%p1438_p6), 1, %s1095_s16   ;;  %p1439_p3 = scmp.ne.s32.totalorder (!%p1438_p6), %s1428_s23, 0 }
  0x6c   : > { %268 = sbr.rel (%p1438_p6) target bundleno = 394 (0x18a), region = 36  ;;  %s771_s2 = sshll.u32 (!%p1438_p6), %s1323_s10, 3 }
  0x6d   : > { %s271_s12 = scalar_lea.sflag (!%p1438_p6), [#allocation4], %s1323_s10  ;;  %s274_s22 = scalar_lea.vmem (!%p1438_p6), [#allocation3], %s771_s2 }
  0x73   : > { %1074 = dma.done.wait (%p1439_p3), %s271_s12, 128  }
  0x74   : > { %1076 = vsyncadd (%p1439_p3), %s271_s12, 4294967168  ;;  %s279_s14 = sand.u32 1, %s1178_s21   ;;  %s283_s25 = scalar_lea.vmem [#allocation6], %s771_s2 }
  0x75   : > { %s280_s5 = scalar_lea.sflag [#allocation7], %s279_s14 }
  0x76   : > { %1078 = dma.done.wait (%p1439_p3), %s280_s5, 128  }
  0x77   : > { %1080 = vsyncadd (%p1439_p3), %s280_s5, 4294967168  ;;  %p1440_p10 = scmp.eq.s32.totalorder %s1178_s21, 0 }
  0x79   : > { %1082 = dma.done.wait (%p1440_p10), [#allocation7], 512   ;;  %p1441_p13 = pmov %p1440_p10 }
  0x7a   : > { %v335_v0 = vlaneseq  ;;  %v1118_v1 = vmov 1966171168   ;;  %v453_v6 = vld [vmem:[#allocation8] sm:$0xff]  ;;  %v454_v7 = vld [vmem:[#allocation8 + $0x8] sm:$0xff]  ;;  %v455_v8 = vld [vmem:[#allocation8 + $0x10] sm:$0xff]  ;;  %vm436_vm0 = vcmask 261120  }
  0x7b   : > { %1084 = vsyncadd (%p1441_p13), [#allocation7], 4294966784  ;;  %v333_v2 = vunpack.c.l.s4 %v1118_v1  ;;  %v822_v9 = vpack.c.bf16 %v454_v7, %v453_v6  ;;  %v456_v10 = vld [vmem:[#allocation8 + $0x18] sm:$0xff]  ;;  %v328_v11 = vld [vmem:[%s274_s22] sm:$0xff]  ;;  %s774_s21 = sshll.u32 %s1323_s10, 6  ;;  %s789_s8 = sshll.u32 %s1103_s18, 10 }
  0x7c   : > { %v336_v3 = vshrl.u32 %v335_v0, 7  ;;  %v826_v12 = vpack.c.bf16 %v456_v10, %v455_v8  ;;  %v331_v15 = vcombine.high %v328_v11, %v328_v11  ;;  %v329_v19 = vld [vmem:[%s283_s25] sm:$0xff]  ;;  %v775_v60 = vld [vmem:[%s1418_s3] ss:$0 sm:$0xff]  ;;  %s319_s30 = scalar_lea.vmem [#allocation9], %s774_s21  ;;  %s1366_s18 = scalar_lea.hbm %s1419_s4, %s789_s8 }
  0x7d   : > { %v334_v4 = vunpack.c.0.s8 %v333_v2  ;;  %823 = vmatprep.subr.bf16.mxu0 %v822_v9  ;;  %830 = vmatprep.subr.bf16.mxu1 %v822_v9  ;;  %s620_s27 = sshll.u32 %s319_s30, 4  ;;  %s603_s6 = scalar_lea.sflag [#allocation5], %s1323_s10  ;;  %s1361_s27 = int_to_ptr.vmem [resolvable:$true] %s620_s27 }
  0x7e   : > { %v382_v14 = vsub.s32 0, %v336_v3  ;;  %825 = vmatpush3.bf16.msra.mxu0 %v822_v9  ;;  %832 = vmatpush3.bf16.msra.mxu1 %v822_v9  ;;  %s1021_s11 = scalar_lea.vmem %s1361_s27, 1024  ;;  %p1442_p0 = scmp.ne.s32.totalorder %s1436_s28, 0 }
  0x7f   : > { %v337_v5 = vsub.s32 %v334_v4, %v336_v3  ;;  %827 = vmatprep.subr.bf16.mxu0 %v826_v12  ;;  %831 = vmatprep.subr.bf16.mxu1 %v826_v12  ;;  %p1022_p12 = scmp.ne.s32.totalorder %s1361_s27, %s1021_s11  ;;  %s1119_s13 = smov [#allocation9]  }
  0x80   : > { %s1025_s9 = sshll.u32 %s1119_s13, 4  ;;  %s1026_s9 = int_to_ptr.vmem [resolvable:$false] %s1025_s9 }
  0x81   : > { %v338_v13 = vrot.slane %v328_v11, %v337_v5  ;;  %v345_v18 = vrot.slane %v331_v15, %v337_v5  ;;  %p1023_p5 = pnand %p1022_p12, %p1442_p0  ;;  %s1027_s2 = scalar_lea.vmem %s1026_s9, 2048 }
  0x82   : > { %829 = vmatpush3.bf16.msra.mxu0 %v826_v12  ;;  %833 = vmatpush3.bf16.msra.mxu1 %v826_v12  ;;  %p1028_p1 = scmp.lt.s32.totalorder %s1361_s27, %s1026_s9  ;;  %p1029_p2 = scmp.lt.s32.totalorder %s1027_s2, %s1021_s11 }
  0x83   : > { %v346_v16 = vcombine.high %v338_v13, %v338_v13  ;;  %v354_v17 = vrot.slane %v338_v13, %v337_v5  ;;  %v347_v23 = vcombine.high %v345_v18, %v345_v18  ;;  %v361_v24 = vrot.slane %v345_v18, %v337_v5  ;;  %p1024_p9 = pneg %p1023_p5 }
  0x84   : > { %p1030_p7 = por %p1029_p2, %p1028_p1 }
  0x85   : > { %v376_v20 = vcombine.high %v354_v17, %v354_v17  ;;  %v383_v21 = vrot.slane %v354_v17, %v382_v14  ;;  %v368_v22 = vrot.slane %v346_v16, %v337_v5  ;;  %v375_v27 = vrot.slane %v347_v23, %v337_v5 }
  0x86   : > { %v377_v28 = vcombine.high %v361_v24, %v361_v24  ;;  %v399_v29 = vrot.slane %v361_v24, %v382_v14  ;;  %p1031_p4 = pnand %p1030_p7, %p1024_p9 }
  0x87   : > { %v420_v25 = vadd.f32 %v383_v21, %v329_v19  ;;  %v387_v26 = vrot.slane %v368_v22, %v382_v14  ;;  %v391_v30 = vrot.slane %v376_v20, %v382_v14  ;;  %v378_v31 = vcombine.high %v368_v22, %v368_v22 }
  0x88   : > { %v403_v33 = vrot.slane %v375_v27, %v382_v14  ;;  %v379_v34 = vcombine.high %v375_v27, %v375_v27  ;;  %v424_v35 = vadd.f32 %v399_v29, %v329_v19  ;;  %v407_v38 = vrot.slane %v377_v28, %v382_v14 }
  0x89   : > { %917 = vtanh.f32 %v420_v25  ;;  %v421_v32 = vadd.f32 %v387_v26, %v329_v19  ;;  %v422_v36 = vadd.f32 %v391_v30, %v329_v19  ;;  %v395_v37 = vrot.slane %v378_v31, %v382_v14 }
  0x8a   : > { %v425_v39 = vadd.f32 %v403_v33, %v329_v19  ;;  %v411_v40 = vrot.slane %v379_v34, %v382_v14  ;;  %v426_v42 = vadd.f32 %v407_v38, %v329_v19 }
  0x8b   : > { %919 = vtanh.f32 %v421_v32  ;;  %v423_v41 = vadd.f32 %v395_v37, %v329_v19 }
  0x8c   : > { %921 = vtanh.f32 %v424_v35  ;;  %v427_v43 = vadd.f32 %v411_v40, %v329_v19 }
  0x8d   : > { %923 = vtanh.f32 %v425_v39 }
  0x8e   : > { %925 = vtanh.f32 %v422_v36 }
  0x8f   : > { %927 = vtanh.f32 %v423_v41 }
  0x90   : > { %929 = vtanh.f32 %v426_v42 }
  0x91   : > { %931 = vtanh.f32 %v427_v43 }
  0x93   : > { %v918_v44 = vpop.eup %917 }
  0x94   : > { %437 = vst.msk [vmem:[#allocation2] sm:$0xff] %vm436_vm0, %v918_v44 }
  0x95   : > { %v920_v45 = vpop.eup %919 }
  0x96   : > { %v922_v46 = vpop.eup %921  ;;  %438 = vst.msk [vmem:[#allocation2 + $0x8] sm:$0xff] %vm436_vm0, %v920_v45 }
  0x97   : > { %v924_v47 = vpop.eup %923  ;;  %441 = vst.msk [vmem:[#allocation2 + $0x20] sm:$0xff] %vm436_vm0, %v922_v46 }
  0x98   : > { %v926_v48 = vpop.eup %925  ;;  %442 = vst.msk [vmem:[#allocation2 + $0x28] sm:$0xff] %vm436_vm0, %v924_v47 }
  0x99   : > { %v928_v49 = vpop.eup %927  ;;  %439 = vst.msk [vmem:[#allocation2 + $0x10] sm:$0xff] %vm436_vm0, %v926_v48 }
  0x9a   : > { %v930_v50 = vpop.eup %929  ;;  %440 = vst.msk [vmem:[#allocation2 + $0x18] sm:$0xff] %vm436_vm0, %v928_v49 }
  0x9b   : > { %v932_v51 = vpop.eup %931  ;;  %v445_v52 = vld [vmem:[#allocation2] sm:$0xff]  ;;  %443 = vst.msk [vmem:[#allocation2 + $0x30] sm:$0xff] %vm436_vm0, %v930_v50 }
  0x9c   : > { %810 = vmatprep.mubr.msk.f32.mxu0 %vm436_vm0, %v445_v52  ;;  %444 = vst.msk [vmem:[#allocation2 + $0x38] sm:$0xff] %vm436_vm0, %v932_v51 }
  0x9d   : > { %v446_v53 = vld [vmem:[#allocation2 + $0x8] sm:$0xff] }
  0x9e   : > { %811 = vmatmul.mubr.msk.f32.vlgmr.msra.gmra.mrb[0].mxu0 %vm436_vm0, %v446_v53  ;;  %v449_v54 = vld [vmem:[#allocation2 + $0x20] sm:$0xff] }
  0x9f   : > { %816 = vmatprep.mubr.msk.f32.mxu1 %vm436_vm0, %v449_v54  ;;  %v450_v55 = vld [vmem:[#allocation2 + $0x28] sm:$0xff] }
  0xa0   : > { %817 = vmatmul.mubr.msk.f32.vlgmr.msra.gmra.mrb[0].mxu1 %vm436_vm0, %v450_v55  ;;  %v447_v56 = vld [vmem:[#allocation2 + $0x10] sm:$0xff] }
  0xa1   : > { %813 = vmatprep.mubr.msk.f32.mxu0 %vm436_vm0, %v447_v56  ;;  %v448_v57 = vld [vmem:[#allocation2 + $0x18] sm:$0xff] }
  0xa2   : > { %814 = vmatmul.mubr.msk.f32.gmra.mrb[2].mxu0 %vm436_vm0, %v448_v57  ;;  %v451_v58 = vld [vmem:[#allocation2 + $0x30] sm:$0xff] }
  0xa3   : > { %819 = vmatprep.mubr.msk.f32.mxu1 %vm436_vm0, %v451_v58  ;;  %v452_v59 = vld [vmem:[#allocation2 + $0x38] sm:$0xff] }
  0xa4   : > { %820 = vmatmul.mubr.msk.f32.gmra.mrb[2].mxu1 %vm436_vm0, %v452_v59 }
 0x171   : > { %v812_v61 = vpop.f32.mrb[0].mxu0 }
 0x172   : > { %v561_v62 = vadd.f32 %v812_v61, %v775_v60  ;;  %v555_v63 = vpop.f32.mrb[1].mxu0 }
 0x173   : > { %v556_v0 = vadd.f32 %v775_v60, %v555_v63  ;;  %v818_v1 = vpop.f32.mrb[0].mxu1 }
 0x174   : > { %595 = vst [vmem:[%s319_s30 + $0x8] sm:$0xff] %v561_v62  ;;  %v581_v2 = vadd.f32 %v818_v1, %v775_v60  ;;  %v575_v3 = vpop.f32.mrb[1].mxu1 }
 0x175   : > { %594 = vst [vmem:[%s319_s30] sm:$0xff] %v556_v0  ;;  %v576_v4 = vadd.f32 %v775_v60, %v575_v3  ;;  %v815_v5 = vpop.f32.mrb[2].mxu0 }
 0x176   : > { %599 = vst [vmem:[%s319_s30 + $0x28] sm:$0xff] %v581_v2  ;;  %v571_v6 = vadd.f32 %v815_v5, %v775_v60  ;;  %v565_v7 = vpop.f32.mrb[3].mxu0 }
 0x177   : > { %598 = vst [vmem:[%s319_s30 + $0x20] sm:$0xff] %v576_v4  ;;  %v566_v8 = vadd.f32 %v775_v60, %v565_v7  ;;  %v821_v9 = vpop.f32.mrb[2].mxu1 }
 0x178   : > { %597 = vst [vmem:[%s319_s30 + $0x18] sm:$0xff] %v571_v6  ;;  %v591_v10 = vadd.f32 %v821_v9, %v775_v60  ;;  %v585_v11 = vpop.f32.mrb[3].mxu1 }
 0x179   : > { %596 = vst [vmem:[%s319_s30 + $0x10] sm:$0xff] %v566_v8  ;;  %v586_v12 = vadd.f32 %v775_v60, %v585_v11 }
 0x17a   : > { %601 = vst [vmem:[%s319_s30 + $0x38] sm:$0xff] %v591_v10 }
 0x17b   : > { %600 = vst [vmem:[%s319_s30 + $0x30] sm:$0xff] %v586_v12 }
 0x17c   : > { %1034 = shalt.err (!%p1031_p4)
}
 0x17d   : > { %s1035_s12 = scalar_lea.hbm %s1366_s18, 1024  ;;  %s1039_s5 = scalar_lea.hbm %s1419_s4, 2048 }
 0x17e   : > { %p1036_p8 = scmp.ne.s32.totalorder %s1366_s18, %s1035_s12  ;;  %p1040_p3 = scmp.lt.u32.totalorder %s1366_s18, %s1419_s4 }
 0x17f   : > { %p1041_p10 = scmp.lt.u32.totalorder %s1039_s5, %s1035_s12  ;;  %p1043_p12 = scmp.lt.u32.totalorder %s1035_s12, %s1366_s18 }
 0x180   : > { %p1037_p11 = pnand %p1036_p8, %p1442_p0 }
 0x181   : > { %p1042_p13 = por %p1041_p10, %p1040_p3 }
 0x182   : > { %p1038_p6 = pneg %p1037_p11 }
 0x183   : > { %p1044_p5 = por %p1043_p12, %p1042_p13 }
 0x185   : > { %p1045_p9 = pnand %p1044_p5, %p1038_p6 }
 0x187   : > { %1048 = shalt.err (!%p1045_p9)
}
 0x188   : > { %s1120_s23 = smov 128   ;;  %s1121_s29 = smov 8  }
 0x189   : > { %842 = dma.vmem_to_hbm [thread:$0]  (%p1442_p0), %s1361_s27, 1024, %s1366_s18, %s603_s6, %s1120_s23, %s1120_s23, %s1121_s29  }
 0x18a PF: > { %s635_s30 = sand.u32 1, %s1091_s15   ;;  %p1443_p1 = scmp.ne.s32.totalorder %s1429_s24, 0 }
 0x18b   : > { %p1444_p2 = scmp.ge.s32.totalorder %s1111_s20, 2  ;;  %s636_s8 = scalar_lea.sflag [#allocation5], %s635_s30 }
 0x18d   : > { %p856_p7 = pnand %p1444_p2, %p1443_p1 }
 0x18f   : > { %1086 = dma.done.wait (!%p856_p7), %s636_s8, 1024  }
 0x190   : > { %1088 = vsyncadd (!%p856_p7), %s636_s8, 4294966272  ;;  %s23_s20 = sadd.s32 1, %s1111_s20   ;;  %s1445_s18 = sld [smem:[#allocation14_spill]] }
 0x191   : > { %p20_p4 = scmp.ge.s32.totalorder %s23_s20, 4   ;;  %s1446_s19 = sld [smem:[#allocation15_spill]] }
 0x192   : > { %s1447_s15 = smov %s1095_s16  ;;  %s1448_s16 = smov %s1099_s17 }
 0x193   : > { %s1449_s17 = smov %s1250_s7  ;;  %22 = sbr.rel (!%p20_p4) target bundleno = 10 (0xa), region = 106 }
 0x19a   :  { %641 = vsyncpa [#allocation4], 1 }
 0x19b   :  { %643 = vsyncpa [#allocation4 + $0x1], 1 }
 0x19c   :  { %644 = vsyncpa [#allocation7], 1 }
 0x19d   :  { %646 = vsyncpa [#allocation7 + $0x1], 1 }
 0x19e   :  { %647 = vsyncpa [#allocation5], 1 }
 0x19f   :  { %649 = vsyncpa [#allocation5 + $0x1], 1 }

</bundles_post_ra>
